<compile_context>
chip_gen: v6e
topology: v6e:2x2x1
jax: 0.10.0
libtpu: 0.0.40
codegen_flags: <defaults>
</compile_context>

<pallas_src>
import math

import jax
import jax.numpy as jnp
from jax.experimental import pallas as pl
from jax.experimental.pallas import tpu as pltpu


def _round_up(x, mult):
    return ((x + mult - 1) // mult) * mult


def _cdiv(a, b):
    return (a + b - 1) // b


# ----------------------------- kernel bodies --------------------------------

def _query_kernel_single(x_ref, w_ref, o_ref):
    # Full-K contraction: one long (tm, K) @ (K, tn) per output tile.
    o_ref[...] = jnp.dot(
        x_ref[...], w_ref[...], preferred_element_type=jnp.float32
    ).astype(o_ref.dtype)


def _query_kernel_kacc_f32(x_ref, w_ref, o_ref):
    # K-tiled, f32 output: accumulate directly into the resident output block.
    @pl.when(pl.program_id(2) == 0)
    def _init():
        o_ref[...] = jnp.zeros_like(o_ref)

    o_ref[...] += jnp.dot(x_ref[...], w_ref[...], preferred_element_type=jnp.float32)


def _query_kernel_kacc(x_ref, w_ref, o_ref, acc_ref):
    # K-tiled, non-f32 output: f32 scratch accumulator, cast on the last K step.
    @pl.when(pl.program_id(2) == 0)
    def _init():
        acc_ref[...] = jnp.zeros_like(acc_ref)

    acc_ref[...] += jnp.dot(x_ref[...], w_ref[...], preferred_element_type=jnp.float32)

    @pl.when(pl.program_id(2) == pl.num_programs(2) - 1)
    def _finalize():
        o_ref[...] = acc_ref[...].astype(o_ref.dtype)


# ------------------------------- wrapper -------------------------------------

def query_forward(x, weight, *, compute_dtype=None,
                  tm_max=1024, tn_max=512, tk_max=1024):
    """Equivalent of Query.forward: y = x @ weight.T (no bias).

    x:      (..., dim_input)
    weight: (dim_attn, dim_input)  -- PyTorch nn.Linear layout.
    compute_dtype: optional MXU operand dtype (e.g. jnp.bfloat16). Accumulation
                   is always f32 and the output keeps x.dtype.
    """
    x = jnp.asarray(x)
    weight = jnp.asarray(weight)
    dim_attn, dim_input = weight.shape
    orig_shape = x.shape
    assert orig_shape[-1] == dim_input
    out_dtype = x.dtype

    m = math.prod(orig_shape[:-1])
    if m == 0:
        return jnp.zeros((*orig_shape[:-1], dim_attn), dtype=out_dtype)

    x2d = x.reshape(m, dim_input)
    # Canonical (M,K)@(K,N): present the weight pre-transposed. In practice the
    # parameter should be stored as (dim_input, dim_attn) so this is free.
    w_t = weight.T  # (dim_input, dim_attn)

    if compute_dtype is not None:
        x2d = x2d.astype(compute_dtype)
        w_t = w_t.astype(compute_dtype)

    op_dtype = x2d.dtype
    itemsize = jnp.dtype(op_dtype).itemsize
    out_itemsize = jnp.dtype(out_dtype).itemsize
    sublane = {4: 8, 2: 16, 1: 32}.get(itemsize, 8)
    out_is_f32 = jnp.dtype(out_dtype) == jnp.dtype(jnp.float32)

    # ---- generation-aware VMEM budget --------------------------------------
    try:
        vmem_cap = int(getattr(pltpu.get_tpu_info(), "vmem_capacity_bytes",
                               64 * 1024 * 1024))
    except Exception:  # pragma: no cover - info query not available
        vmem_cap = 64 * 1024 * 1024  # conservative: v7x per-TC VMEM
    vmem_budget = (vmem_cap * 3) // 4  # leave headroom for compiler scratch

    # ---- tile selection (minimize padding, dtype-aware alignment) ----------
    def pick_tile(size, cap, align):
        size_al = _round_up(max(size, 1), align)
        n_tiles = max(1, _cdiv(size_al, cap))
        return min(_round_up(_cdiv(size_al, n_tiles), align), size_al)

    kp_al = _round_up(dim_input, 128)
    np_al = _round_up(dim_attn, 128)

    tm = pick_tile(m, tm_max, sublane)
    tn = pick_tile(np_al, tn_max, 128)

    # Working-set estimators (double-buffered inputs & output).
    def ws_single(tm_, tn_):
        return (2 * (tm_ * kp_al + kp_al * tn_) * itemsize
                + 2 * tm_ * tn_ * out_itemsize)

    def ws_k(tm_, tn_, tk_):
        ws = (2 * (tm_ * tk_ + tk_ * tn_) * itemsize
              + 2 * tm_ * tn_ * out_itemsize)
        if not out_is_f32:
            ws += tm_ * tn_ * 4  # f32 accumulator scratch
        return ws

    # Collapse K entirely if the full-K panel pair fits in the VMEM budget.
    collapse_k = ws_single(tm, tn) <= vmem_budget
    if collapse_k:
        tk = kp_al
    else:
        tk = pick_tile(kp_al, tk_max, 128)
        while ws_k(tm, tn, tk) > vmem_budget and tk > 128:
            tk = max(128, _round_up(tk // 2, 128))
        while ws_k(tm, tn, tk) > vmem_budget and tm > sublane:
            tm = max(sublane, _round_up(tm // 2, sublane))
        while ws_k(tm, tn, tk) > vmem_budget and tn > 128:
            tn = max(128, _round_up(tn // 2, 128))

    # ---- pad operands to whole tiles ----------------------------------------
    mp = _round_up(m, tm)
    npad = _round_up(np_al, tn)
    kpad = _round_up(kp_al, tk)

    if (mp, kpad) != (m, dim_input):
        x2d = jnp.pad(x2d, ((0, mp - m), (0, kpad - dim_input)))
    if (kpad, npad) != (dim_input, dim_attn):
        w_t = jnp.pad(w_t, ((0, kpad - dim_input), (0, npad - dim_attn)))

    grid_m, grid_n, grid_k = mp // tm, npad // tn, kpad // tk

    # Streamed bytes: x re-read grid_n times, W re-read grid_m times, out once.
    cost = pl.CostEstimate(
        flops=2 * m * dim_input * dim_attn,
        transcendentals=0,
        bytes_accessed=(mp * kpad * itemsize * grid_n
                        + kpad * npad * itemsize * grid_m
                        + mp * npad * out_itemsize),
    )

    ws = ws_single(tm, tn) if collapse_k else ws_k(tm, tn, tk)
    vmem_limit = int(min(vmem_budget, max(2 * ws, 32 * 1024 * 1024)))

    if collapse_k:
        grid = (grid_m, grid_n)
        in_specs = [
            pl.BlockSpec((tm, tk), lambda i, j: (i, 0)),
            pl.BlockSpec((tk, tn), lambda i, j: (0, j)),
        ]
        out_specs = pl.BlockSpec((tm, tn), lambda i, j: (i, j))
        scratch_shapes = []
        kernel = _query_kernel_single
        dim_sem = ("parallel", "parallel")
    else:
        grid = (grid_m, grid_n, grid_k)
        in_specs = [
            pl.BlockSpec((tm, tk), lambda i, j, k: (i, k)),
            pl.BlockSpec((tk, tn), lambda i, j, k: (k, j)),
        ]
        out_specs = pl.BlockSpec((tm, tn), lambda i, j, k: (i, j))
        if out_is_f32:
            scratch_shapes = []
            kernel = _query_kernel_kacc_f32
        else:
            scratch_shapes = [pltpu.VMEM((tm, tn), jnp.float32)]
            kernel = _query_kernel_kacc
        dim_sem = ("parallel", "parallel", "arbitrary")

    out = pl.pallas_call(
        kernel,
        out_shape=jax.ShapeDtypeStruct((mp, npad), out_dtype),
        grid_spec=pltpu.PrefetchScalarGridSpec(
            num_scalar_prefetch=0,
            grid=grid,
            in_specs=in_specs,
            out_specs=out_specs,
            scratch_shapes=scratch_shapes,
        ),
        compiler_params=pltpu.CompilerParams(
            dimension_semantics=dim_sem,
            vmem_limit_bytes=vmem_limit,
        ),
        cost_estimate=cost,
    )(x2d, w_t)

    out = out[:m, :dim_attn]
    return out.reshape(*orig_shape[:-1], dim_attn)


if __name__ == "__main__":
    key = jax.random.PRNGKey(0)
    kx, kw = jax.random.split(key)

    batch, seq = 2, 8
    dim_input, dim_attn = 32, 32

    x = jax.random.normal(kx, (batch, seq, dim_input), dtype=jnp.float32)
    # Deterministic init mimicking nn.Linear default: U(-1/sqrt(fan_in), 1/sqrt(fan_in))
    bound = 1.0 / math.sqrt(dim_input)
    weight = jax.random.uniform(
        kw, (dim_attn, dim_input), dtype=jnp.float32, minval=-bound, maxval=bound
    )

    y = query_forward(x, weight)
    jax.block_until_ready(y)

    # Sanity check against plain JAX reference (y = x @ W^T).
    y_ref = jnp.einsum("bsd,ad->bsa", x, weight)
    assert y.shape == (batch, seq, dim_attn)
    assert jnp.allclose(y, y_ref, atol=1e-5, rtol=1e-5)

    print("KERNEL_OK")
</pallas_src>

<mosaic_0001>
module attributes {stable_mosaic.version = 11 : i64} {
  func.func @_query_kernel_single(%arg0: i32, %arg1: i32, %arg2: memref<16x128xf32, #tpu.memory_space<vmem>>, %arg3: memref<128x128xf32, #tpu.memory_space<vmem>>, %arg4: memref<16x128xf32, #tpu.memory_space<vmem>>) attributes {dimension_semantics = [#tpu.dimension_semantics<parallel>, #tpu.dimension_semantics<parallel>], iteration_bounds = array<i64: 1, 1>, scalar_prefetch = 0 : i64, scratch_operands = 0 : i64, tpu.core_type = #tpu.core_type<tc>, window_params = [{transform_indices = @transform_0, window_bounds = array<i64: 16, 128>}, {transform_indices = @transform_1, window_bounds = array<i64: 128, 128>}, {transform_indices = @transform_2, window_bounds = array<i64: 16, 128>}]} {
    %c0 = arith.constant 0 : index
    %c0_0 = arith.constant 0 : index
    %0 = vector.load %arg2[%c0, %c0_0] : memref<16x128xf32, #tpu.memory_space<vmem>>, vector<16x128xf32>
    %c0_1 = arith.constant 0 : index
    %c0_2 = arith.constant 0 : index
    %1 = vector.load %arg3[%c0_1, %c0_2] : memref<128x128xf32, #tpu.memory_space<vmem>>, vector<128x128xf32>
    %cst = arith.constant dense<0.000000e+00> : vector<16x128xf32>
    %2 = tpu.matmul %0, %1, %cst {dimension_numbers = #tpu.dot_dimension_numbers<[1], [0], [0], [1], [0, 0, 1, 1], [], []>} : vector<16x128xf32>, vector<128x128xf32>, vector<16x128xf32> -> vector<16x128xf32>
    %c0_3 = arith.constant 0 : index
    %c0_4 = arith.constant 0 : index
    %3 = vector.load %arg4[%c0_3, %c0_4] : memref<16x128xf32, #tpu.memory_space<vmem>>, vector<16x128xf32>
    tpu.vector_store %arg4[%c0_3, %c0_4], %2 {strides = array<i32>} : memref<16x128xf32, #tpu.memory_space<vmem>>, vector<16x128xf32>,
    return
  }
  func.func @transform_0(%arg0: i32, %arg1: i32) -> (i32, i32) {
    %c0_i32 = arith.constant 0 : i32
    %c0_i32_0 = arith.constant 0 : i32
    return %arg0, %c0_i32 : i32, i32
  }
  func.func @transform_1(%arg0: i32, %arg1: i32) -> (i32, i32) {
    %c0_i32 = arith.constant 0 : i32
    %c0_i32_0 = arith.constant 0 : i32
    return %c0_i32, %arg1 : i32, i32
  }
  func.func @transform_2(%arg0: i32, %arg1: i32) -> (i32, i32) {
    %c0_i32 = arith.constant 0 : i32
    return %arg0, %arg1 : i32, i32
  }
}

</mosaic_0001>

<bundles_post_ra>
// kernel: tpu_custom_call.1
= control target key start
LH: loop header
LB: loop body
LE: loop exit
PB: predicated region body
PF: predicated region fallthrough
CT: control target
= control target key end

     0   :  { %7 = vsyncpa [#allocation3], 0  ;;  %s315_s0 = inlined_call_operand.hbm [shape: f32[16,128], index: 0, kind: input, shape index: {}]   ;;  %s316_s1 = inlined_call_operand.hbm [shape: f32[128,128], index: 1, kind: input, shape index: {}]   ;;  %s317_s2 = inlined_call_operand.hbm [shape: f32[16,128], index: 2, kind: output, shape index: {}]  }
   0x1   :  { %8 = vsyncpa [#allocation6], 0 }
   0x2   :  { %9 = vsyncpa [#allocation4], 0  ;;  %s277_s9 = smov [#allocation2]  }
   0x3   :  { %s15_s10 = sshll.u32 %s277_s9, 4  ;;  %s16_s10 = int_to_ptr.vmem [resolvable:$true] %s15_s10 }
   0x4   :  { %s219_s11 = scalar_lea.vmem %s16_s10, 256  ;;  %p224_p1 = scmp.lt.s32.totalorder %s16_s10, %s16_s10 }
   0x5   :  { %p220_p0 = scmp.ne.s32.totalorder %s16_s10, %s219_s11  ;;  %p225_p2 = scmp.lt.s32.totalorder %s219_s11, %s219_s11 }
   0x7   :  { %p226_p3 = por %p225_p2, %p224_p1 }
   0x9   :  { %p227_p4 = pnand %p226_p3, %p220_p0 }
   0xb   :  { %230 = shalt.err (!%p227_p4)
}
   0xc   :  { %s278_s12 = smov 128   ;;  %s279_s13 = smov 8  }
   0xd   :  { %21 = dma.hbm_to_vmem [thread:$0]  %s315_s0, 256, %s16_s10, [#allocation3], %s278_s12, %s278_s12, %s279_s13  }
   0xe   :  { %s280_s16 = smov [#allocation5]  }
   0xf   :  { %s27_s17 = sshll.u32 %s280_s16, 4  ;;  %s28_s17 = int_to_ptr.vmem [resolvable:$true] %s27_s17 }
  0x10   :  { %s239_s18 = scalar_lea.vmem %s28_s17, 2048  ;;  %p244_p6 = scmp.lt.s32.totalorder %s28_s17, %s28_s17 }
  0x11   :  { %p240_p5 = scmp.ne.s32.totalorder %s28_s17, %s239_s18  ;;  %p245_p7 = scmp.lt.s32.totalorder %s239_s18, %s239_s18 }
  0x13   :  { %p246_p8 = por %p245_p7, %p244_p6 }
  0x15   :  { %p247_p9 = pnand %p246_p8, %p240_p5 }
  0x17   :  { %250 = shalt.err (!%p247_p9)
}
  0x18   :  { %33 = dma.hbm_to_vmem [thread:$0]  %s316_s1, 2048, %s28_s17, [#allocation6], %s278_s12, %s278_s12, %s279_s13  }
  0x19   :  { %271 = dma.done.wait [#allocation3], 256  }
  0x1a   :  { %272 = vsyncadd [#allocation3], 4294967040 }
  0x1b   :  { %273 = dma.done.wait [#allocation6], 2048  }
  0x1c   :  { %274 = vsyncadd [#allocation6], 4294965248  ;;  %v57_v0 = vld [vmem:[#allocation5 + $0x78] sm:$0xff]  ;;  %v56_v1 = vld [vmem:[#allocation5 + $0x70] sm:$0xff]  ;;  %s281_s0 = smov [#allocation7]  }
  0x1d   :  { %171 = vmatprep.subr.mxu0 %v57_v0  ;;  %v55_v2 = vld [vmem:[#allocation5 + $0x68] sm:$0xff]  ;;  %v54_v3 = vld [vmem:[#allocation5 + $0x60] sm:$0xff]  ;;  %v40_v4 = vld [vmem:[#allocation2] sm:$0xff]  ;;  %s140_s1 = sshll.u32 %s281_s0, 4  ;;  %s141_s1 = int_to_ptr.vmem [resolvable:$true] %s140_s1 }
  0x1e   :  { %172 = vmatpush3.msra.mxu0 %v57_v0  ;;  %v53_v5 = vld [vmem:[#allocation5 + $0x58] sm:$0xff]  ;;  %203 = vmatprep.mubr.f32.mxu0 %v40_v4  ;;  %v52_v6 = vld [vmem:[#allocation5 + $0x50] sm:$0xff]  ;;  %v51_v7 = vld [vmem:[#allocation5 + $0x48] sm:$0xff]  ;;  %s251_s21 = scalar_lea.vmem %s141_s1, 256  ;;  %p256_p11 = scmp.lt.s32.totalorder %s141_s1, %s141_s1 }
  0x1f   :  { %173 = vmatprep.subr.mxu0 %v56_v1  ;;  %v50_v8 = vld [vmem:[#allocation5 + $0x40] sm:$0xff]  ;;  %v49_v9 = vld [vmem:[#allocation5 + $0x38] sm:$0xff]  ;;  %v48_v10 = vld [vmem:[#allocation5 + $0x30] sm:$0xff]  ;;  %p252_p10 = scmp.ne.s32.totalorder %s141_s1, %s251_s21  ;;  %p257_p12 = scmp.lt.s32.totalorder %s251_s21, %s251_s21 }
  0x20   :  { %174 = vmatpush3.msra.mxu0 %v56_v1  ;;  %v47_v11 = vld [vmem:[#allocation5 + $0x28] sm:$0xff]  ;;  %v46_v12 = vld [vmem:[#allocation5 + $0x20] sm:$0xff]  ;;  %v45_v13 = vld [vmem:[#allocation5 + $0x18] sm:$0xff] }
  0x21   :  { %175 = vmatprep.subr.mxu0 %v55_v2  ;;  %v44_v14 = vld [vmem:[#allocation5 + $0x10] sm:$0xff]  ;;  %v43_v15 = vld [vmem:[#allocation5 + $0x8] sm:$0xff]  ;;  %v42_v16 = vld [vmem:[#allocation5] sm:$0xff]  ;;  %p258_p13 = por %p257_p12, %p256_p11 }
  0x22   :  { %176 = vmatpush3.msra.mxu0 %v55_v2  ;;  %v41_v17 = vld [vmem:[#allocation2 + $0x8] sm:$0xff] }
  0x23   :  { %177 = vmatprep.subr.mxu0 %v54_v3  ;;  %p259_p0 = pnand %p258_p13, %p252_p10 }
  0x24   :  { %178 = vmatpush3.msra.mxu0 %v54_v3 }
  0x25   :  { %179 = vmatprep.subr.mxu0 %v53_v5 }
  0x26   :  { %180 = vmatpush3.msra.mxu0 %v53_v5 }
  0x27   :  { %181 = vmatprep.subr.mxu0 %v52_v6 }
  0x28   :  { %182 = vmatpush3.msra.mxu0 %v52_v6 }
  0x29   :  { %183 = vmatprep.subr.mxu0 %v51_v7 }
  0x2a   :  { %184 = vmatpush3.msra.mxu0 %v51_v7 }
  0x2b   :  { %185 = vmatprep.subr.mxu0 %v50_v8 }
  0x2c   :  { %186 = vmatpush3.msra.mxu0 %v50_v8 }
  0x2d   :  { %187 = vmatprep.subr.mxu0 %v49_v9 }
  0x2e   :  { %188 = vmatpush3.msra.mxu0 %v49_v9 }
  0x2f   :  { %189 = vmatprep.subr.mxu0 %v48_v10 }
  0x30   :  { %190 = vmatpush3.msra.mxu0 %v48_v10 }
  0x31   :  { %191 = vmatprep.subr.mxu0 %v47_v11 }
  0x32   :  { %192 = vmatpush3.msra.mxu0 %v47_v11 }
  0x33   :  { %193 = vmatprep.subr.mxu0 %v46_v12 }
  0x34   :  { %194 = vmatpush3.msra.mxu0 %v46_v12 }
  0x35   :  { %195 = vmatprep.subr.mxu0 %v45_v13 }
  0x36   :  { %196 = vmatpush3.msra.mxu0 %v45_v13 }
  0x37   :  { %197 = vmatprep.subr.mxu0 %v44_v14 }
  0x38   :  { %198 = vmatpush3.msra.mxu0 %v44_v14 }
  0x39   :  { %199 = vmatprep.subr.mxu0 %v43_v15 }
  0x3a   :  { %200 = vmatpush3.msra.mxu0 %v43_v15 }
  0x3b   :  { %201 = vmatprep.subr.mxu0 %v42_v16 }
  0x3c   :  { %202 = vmatpush3.msra.mxu0 %v42_v16 }
  0x3d   :  { %204 = vmatmul.mubr.f32.vlgmr.msra.gmra.mxu0 %v41_v17 }
  0xfd   :  { %v205_v18 = vpop.f32.mrf.mxu0 }
  0xfe   :  { %134 = vst [vmem:[#allocation7 + $0x8] sm:$0xff] %v205_v18 }
  0xff   :  { %v124_v19 = vpop.f32.mrf.mxu0 }
 0x100   :  { %133 = vst [vmem:[#allocation7] sm:$0xff] %v124_v19 }
 0x101   :  { %262 = shalt.err (!%p259_p0)
}
 0x102   :  { %146 = dma.vmem_to_hbm [thread:$0]  %s141_s1, 256, %s317_s2, [#allocation4], %s278_s12, %s278_s12, %s279_s13  }
 0x103   :  { %275 = dma.done.wait [#allocation4], 256  }
 0x104   :  { %276 = vsyncadd [#allocation4], 4294967040 }
 0x105   :  { %150 = vsyncpa [#allocation3], 1 }
 0x106   :  { %151 = vsyncpa [#allocation6], 1 }
 0x107   :  { %152 = vsyncpa [#allocation4], 1 }

</bundles_post_ra>
